<compile_context>
chip_gen: v7x
topology: tpu7x:2x2x1
jax: 0.10.0
libtpu: 0.0.40
codegen_flags: <defaults>
</compile_context>

<pallas_src>
import jax
import jax.numpy as jnp
from jax import lax
from jax.experimental import pallas as pl
from jax.experimental.pallas import tpu as pltpu


def _round_up(n: int, m: int) -> int:
    return ((n + m - 1) // m) * m


def _mlp_kernel(x_ref, w_in_ref, w_m1_ref, w_m2_ref, w_out_ref, o_ref):
    """Fused 4-layer bias-free MLP; one batch tile per grid step.

    Weights are PyTorch layout (out_features, in_features); contract the
    activation's last axis against each weight's last axis (== x @ W.T), so no
    transpose is ever materialized.
    """
    dn = (((1,), (1,)), ((), ()))  # contract lhs dim 1 with rhs dim 1

    x = x_ref[...]

    # in_layer (no activation)
    h = lax.dot_general(x, w_in_ref[...], dn, preferred_element_type=jnp.float32)

    # middle: Linear -> ReLU -> Linear -> ReLU  (ReLU stays in f32 accumulator)
    h = lax.dot_general(h, w_m1_ref[...], dn, preferred_element_type=jnp.float32)
    h = jnp.maximum(h, 0.0)
    h = lax.dot_general(h, w_m2_ref[...], dn, preferred_element_type=jnp.float32)
    h = jnp.maximum(h, 0.0)

    # out_layer -> ReLU
    y = lax.dot_general(h, w_out_ref[...], dn, preferred_element_type=jnp.float32)
    y = jnp.maximum(y, 0.0)

    o_ref[...] = y.astype(o_ref.dtype)


def prepare_weights(w_in, w_mid1, w_mid2, w_out, lane=128):
    """One-time zero-padding of hidden/out feature dims to lane multiples.

    Exact for a bias-free MLP with ReLU: padded rows/cols contribute zeros.
    Returns padded weights (still PyTorch (out, in) layout) + true out_dim.
    """
    hidden = w_in.shape[0]
    out_dim = w_out.shape[0]
    hp = _round_up(hidden, lane)
    op = _round_up(out_dim, lane)

    w_in_p = jnp.pad(w_in, ((0, hp - hidden), (0, 0)))
    w_m1_p = jnp.pad(w_mid1, ((0, hp - hidden), (0, hp - hidden)))
    w_m2_p = jnp.pad(w_mid2, ((0, hp - hidden), (0, hp - hidden)))
    w_out_p = jnp.pad(w_out, ((0, op - out_dim), (0, hp - hidden)))
    return w_in_p, w_m1_p, w_m2_p, w_out_p, out_dim


def model_with_sleep_forward(x, w_in_p, w_m1_p, w_m2_p, w_out_p, out_dim,
                             *, block_b=512):
    """x: (B, dim). Weights are pre-padded PyTorch-layout (out_f_pad, in_f[_pad])."""
    B, dim = x.shape
    hp = w_in_p.shape[0]
    op = w_out_p.shape[0]

    # Batch tile: multiple of 8 sublanes, as large as reasonable (capped).
    TB = min(block_b, _round_up(B, 8))
    Bp = _round_up(B, TB)
    if Bp != B:
        x = jnp.pad(x, ((0, Bp - B), (0, 0)))

    grid = (Bp // TB,)

    itemsize = x.dtype.itemsize
    flops = 2 * Bp * (dim * hp + 2 * hp * hp + hp * op)
    bytes_accessed = itemsize * (
        Bp * dim + w_in_p.size + w_m1_p.size + w_m2_p.size + w_out_p.size + Bp * op
    )

    def full_w(w):
        # Whole weight as one block, constant index map -> VMEM-resident.
        return pl.BlockSpec(w.shape, lambda i: (0, 0))

    y = pl.pallas_call(
        _mlp_kernel,
        out_shape=jax.ShapeDtypeStruct((Bp, op), x.dtype),
        grid=grid,
        in_specs=[
            pl.BlockSpec((TB, dim), lambda i: (i, 0)),  # batch-tiled activations
            full_w(w_in_p),
            full_w(w_m1_p),
            full_w(w_m2_p),
            full_w(w_out_p),
        ],
        out_specs=pl.BlockSpec((TB, op), lambda i: (i, 0)),
        compiler_params=pltpu.CompilerParams(
            dimension_semantics=("parallel",),
            # Note for v7x (64 MiB VMEM): for hidden_dim >~ 1.4K in f32, store
            # weights in bf16 or add a hidden-dim reduction grid axis.
        ),
        cost_estimate=pl.CostEstimate(
            flops=flops, transcendentals=0, bytes_accessed=bytes_accessed),
    )(x, w_in_p, w_m1_p, w_m2_p, w_out_p)

    # Strip batch / lane padding.
    return y[:B, :out_dim]


def reference_forward(x, w_in, w_mid1, w_mid2, w_out):
    h = x @ w_in.T
    h = jnp.maximum(h @ w_mid1.T, 0.0)
    h = jnp.maximum(h @ w_mid2.T, 0.0)
    return jnp.maximum(h @ w_out.T, 0.0)


if __name__ == "__main__":
    # Small shapes consistent with the module: dim, hidden_dim, out_dim.
    batch, dim, hidden_dim, out_dim = 8, 32, 64, 16

    key = jax.random.PRNGKey(0)
    kx, k0, k1, k2, k3 = jax.random.split(key, 5)

    x = jax.random.normal(kx, (batch, dim), dtype=jnp.float32)

    # Deterministic parameter init (PyTorch Linear layout: (out, in)).
    def init_linear(k, out_f, in_f):
        bound = 1.0 / jnp.sqrt(jnp.float32(in_f))
        return jax.random.uniform(k, (out_f, in_f), jnp.float32, -bound, bound)

    w_in = init_linear(k0, hidden_dim, dim)
    w_mid1 = init_linear(k1, hidden_dim, hidden_dim)
    w_mid2 = init_linear(k2, hidden_dim, hidden_dim)
    w_out = init_linear(k3, out_dim, hidden_dim)

    # One-time weight preparation (lane padding), cached outside the forward.
    w_in_p, w_m1_p, w_m2_p, w_out_p, true_out = prepare_weights(
        w_in, w_mid1, w_mid2, w_out)

    y = model_with_sleep_forward(x, w_in_p, w_m1_p, w_m2_p, w_out_p, true_out)
    y = jax.block_until_ready(y)

    y_ref = reference_forward(x, w_in, w_mid1, w_mid2, w_out)
    assert y.shape == (batch, out_dim)
    assert jnp.allclose(y, y_ref, atol=1e-5, rtol=1e-5), "mismatch vs reference"

    print("KERNEL_OK")
</pallas_src>

<mosaic_0001>
module attributes {stable_mosaic.version = 11 : i64} {
  func.func @_mlp_kernel(%arg0: i32, %arg1: memref<8x32xf32, #tpu.memory_space<vmem>>, %arg2: memref<128x32xf32, #tpu.memory_space<vmem>>, %arg3: memref<128x128xf32, #tpu.memory_space<vmem>>, %arg4: memref<128x128xf32, #tpu.memory_space<vmem>>, %arg5: memref<128x128xf32, #tpu.memory_space<vmem>>, %arg6: memref<8x128xf32, #tpu.memory_space<vmem>>) attributes {dimension_semantics = [#tpu.dimension_semantics<parallel>], iteration_bounds = array<i64: 1>, scalar_prefetch = 0 : i64, scratch_operands = 0 : i64, tpu.core_type = #tpu.core_type<tc>, window_params = [{transform_indices = @transform_0, window_bounds = array<i64: 8, 32>}, {pipeline_mode = #tpu.pipeline_mode<synchronous>, transform_indices = @transform_1, window_bounds = array<i64: 128, 32>}, {pipeline_mode = #tpu.pipeline_mode<synchronous>, transform_indices = @transform_2, window_bounds = array<i64: 128, 128>}, {pipeline_mode = #tpu.pipeline_mode<synchronous>, transform_indices = @transform_3, window_bounds = array<i64: 128, 128>}, {pipeline_mode = #tpu.pipeline_mode<synchronous>, transform_indices = @transform_4, window_bounds = array<i64: 128, 128>}, {transform_indices = @transform_5, window_bounds = array<i64: 8, 128>}]} {
    %c0 = arith.constant 0 : index
    %c0_0 = arith.constant 0 : index
    %0 = vector.load %arg1[%c0, %c0_0] : memref<8x32xf32, #tpu.memory_space<vmem>>, vector<8x32xf32>
    %c0_1 = arith.constant 0 : index
    %c0_2 = arith.constant 0 : index
    %1 = vector.load %arg2[%c0_1, %c0_2] : memref<128x32xf32, #tpu.memory_space<vmem>>, vector<128x32xf32>
    %cst = arith.constant dense<0.000000e+00> : vector<8x128xf32>
    %2 = tpu.matmul %0, %1, %cst {dimension_numbers = #tpu.dot_dimension_numbers<[1], [1], [0], [0], [0, 0, 1, 0], [], []>} : vector<8x32xf32>, vector<128x32xf32>, vector<8x128xf32> -> vector<8x128xf32>
    %c0_3 = arith.constant 0 : index
    %c0_4 = arith.constant 0 : index
    %3 = vector.load %arg3[%c0_3, %c0_4] : memref<128x128xf32, #tpu.memory_space<vmem>>, vector<128x128xf32>
    %cst_5 = arith.constant dense<0.000000e+00> : vector<8x128xf32>
    %4 = tpu.matmul %2, %3, %cst_5 {dimension_numbers = #tpu.dot_dimension_numbers<[1], [1], [0], [0], [0, 0, 1, 0], [], []>} : vector<8x128xf32>, vector<128x128xf32>, vector<8x128xf32> -> vector<8x128xf32>
    %cst_6 = arith.constant 0.000000e+00 : f32
    %5 = vector.broadcast %cst_6 : f32 to vector<8x128xf32>
    %6 = arith.maximumf %4, %5 : vector<8x128xf32>
    %c0_7 = arith.constant 0 : index
    %c0_8 = arith.constant 0 : index
    %7 = vector.load %arg4[%c0_7, %c0_8] : memref<128x128xf32, #tpu.memory_space<vmem>>, vector<128x128xf32>
    %cst_9 = arith.constant dense<0.000000e+00> : vector<8x128xf32>
    %8 = tpu.matmul %6, %7, %cst_9 {dimension_numbers = #tpu.dot_dimension_numbers<[1], [1], [0], [0], [0, 0, 1, 0], [], []>} : vector<8x128xf32>, vector<128x128xf32>, vector<8x128xf32> -> vector<8x128xf32>
    %cst_10 = arith.constant 0.000000e+00 : f32
    %9 = vector.broadcast %cst_10 : f32 to vector<8x128xf32>
    %10 = arith.maximumf %8, %9 : vector<8x128xf32>
    %c0_11 = arith.constant 0 : index
    %c0_12 = arith.constant 0 : index
    %11 = vector.load %arg5[%c0_11, %c0_12] : memref<128x128xf32, #tpu.memory_space<vmem>>, vector<128x128xf32>
    %cst_13 = arith.constant dense<0.000000e+00> : vector<8x128xf32>
    %12 = tpu.matmul %10, %11, %cst_13 {dimension_numbers = #tpu.dot_dimension_numbers<[1], [1], [0], [0], [0, 0, 1, 0], [], []>} : vector<8x128xf32>, vector<128x128xf32>, vector<8x128xf32> -> vector<8x128xf32>
    %cst_14 = arith.constant 0.000000e+00 : f32
    %13 = vector.broadcast %cst_14 : f32 to vector<8x128xf32>
    %14 = arith.maximumf %12, %13 : vector<8x128xf32>
    %c0_15 = arith.constant 0 : index
    %c0_16 = arith.constant 0 : index
    %15 = vector.load %arg6[%c0_15, %c0_16] : memref<8x128xf32, #tpu.memory_space<vmem>>, vector<8x128xf32>
    tpu.vector_store %arg6[%c0_15, %c0_16], %14 {strides = array<i32>} : memref<8x128xf32, #tpu.memory_space<vmem>>, vector<8x128xf32>,
    return
  }
  func.func @transform_0(%arg0: i32) -> (i32, i32) {
    %c0_i32 = arith.constant 0 : i32
    %c0_i32_0 = arith.constant 0 : i32
    return %arg0, %c0_i32 : i32, i32
  }
  func.func @transform_1(%arg0: i32) -> (i32, i32) {
    %c0_i32 = arith.constant 0 : i32
    %c0_i32_0 = arith.constant 0 : i32
    %c0_i32_1 = arith.constant 0 : i32
    return %c0_i32, %c0_i32_0 : i32, i32
  }
  func.func @transform_2(%arg0: i32) -> (i32, i32) {
    %c0_i32 = arith.constant 0 : i32
    %c0_i32_0 = arith.constant 0 : i32
    %c0_i32_1 = arith.constant 0 : i32
    return %c0_i32, %c0_i32_0 : i32, i32
  }
  func.func @transform_3(%arg0: i32) -> (i32, i32) {
    %c0_i32 = arith.constant 0 : i32
    %c0_i32_0 = arith.constant 0 : i32
    %c0_i32_1 = arith.constant 0 : i32
    return %c0_i32, %c0_i32_0 : i32, i32
  }
  func.func @transform_4(%arg0: i32) -> (i32, i32) {
    %c0_i32 = arith.constant 0 : i32
    %c0_i32_0 = arith.constant 0 : i32
    %c0_i32_1 = arith.constant 0 : i32
    return %c0_i32, %c0_i32_0 : i32, i32
  }
  func.func @transform_5(%arg0: i32) -> (i32, i32) {
    %c0_i32 = arith.constant 0 : i32
    %c0_i32_0 = arith.constant 0 : i32
    return %arg0, %c0_i32 : i32, i32
  }
}

</mosaic_0001>

<bundles_post_ra>
// kernel: tpu_custom_call.1
= control target key start
LH: loop header
LB: loop body
LE: loop exit
PB: predicated region body
PF: predicated region fallthrough
CT: control target
= control target key end

     0   :  { %10 = vsyncpa [#allocation3], 0  ;;  %s1111_s0 = inlined_call_operand.vmem [shape: f32[8,32], index: 0, kind: input, shape index: {}]   ;;  %s1112_s1 = inlined_call_operand.vmem [shape: f32[128,32], index: 1, kind: input, shape index: {}]   ;;  %s1113_s2 = inlined_call_operand.vmem [shape: f32[128,128], index: 2, kind: input, shape index: {}]   ;;  %s1114_s3 = inlined_call_operand.hbm [shape: f32[128,128], index: 3, kind: input, shape index: {}]   ;;  %s1115_s4 = inlined_call_operand.hbm [shape: f32[128,128], index: 4, kind: input, shape index: {}]   ;;  %s1116_s5 = inlined_call_operand.hbm [shape: f32[8,128], index: 5, kind: output, shape index: {}]  }
   0x1   :  { %11 = vsyncpa [#allocation6], 0 }
   0x2   :  { %12 = vsyncpa [#allocation4], 0  ;;  %s875_s18 = smov [#allocation2]   ;;  %s803_s22 = scalar_lea.hbm %s1114_s3, 2048 }
   0x3   :  { %s24_s19 = sshll.u32 %s875_s18, 4  ;;  %p804_p0 = scmp.ne.s32.totalorder %s1114_s3, %s803_s22  ;;  %s25_s19 = int_to_ptr.vmem [resolvable:$true] %s24_s19 }
   0x4   :  { %p807_p1 = scmp.lt.u32.totalorder %s803_s22, %s1114_s3 }
   0x6   :  { %p809_p2 = pnand %p807_p1, %p804_p0 }
   0x8   :  { %812 = shalt.err (!%p809_p2)
}
   0x9   :  { %s813_s27 = scalar_lea.vmem %s25_s19, 2048  ;;  %p818_p4 = scmp.lt.s32.totalorder %s25_s19, %s25_s19 }
   0xa   :  { %p814_p3 = scmp.ne.s32.totalorder %s25_s19, %s813_s27  ;;  %p819_p5 = scmp.lt.s32.totalorder %s813_s27, %s813_s27 }
   0xc   :  { %p820_p6 = por %p819_p5, %p818_p4 }
   0xe   :  { %p821_p7 = pnand %p820_p6, %p814_p3 }
  0x10   :  { %824 = shalt.err (!%p821_p7)
}
  0x11   :  { %s876_s28 = smov 128   ;;  %s877_s29 = smov 8  }
  0x12   :  { %30 = dma.hbm_to_vmem [thread:$0]  %s1114_s3, 2048, %s25_s19, [#allocation3], %s876_s28, %s876_s28, %s877_s29  }
  0x13   :  { %s878_s7 = smov [#allocation5]   ;;  %s825_s11 = scalar_lea.hbm %s1115_s4, 2048 }
  0x14   :  { %s36_s8 = sshll.u32 %s878_s7, 4  ;;  %p826_p8 = scmp.ne.s32.totalorder %s1115_s4, %s825_s11  ;;  %s37_s8 = int_to_ptr.vmem [resolvable:$true] %s36_s8 }
  0x15   :  { %p829_p9 = scmp.lt.u32.totalorder %s825_s11, %s1115_s4 }
  0x17   :  { %p831_p10 = pnand %p829_p9, %p826_p8 }
  0x19   :  { %834 = shalt.err (!%p831_p10)
}
  0x1a   :  { %s835_s16 = scalar_lea.vmem %s37_s8, 2048  ;;  %p840_p12 = scmp.lt.s32.totalorder %s37_s8, %s37_s8 }
  0x1b   :  { %p836_p11 = scmp.ne.s32.totalorder %s37_s8, %s835_s16  ;;  %p841_p13 = scmp.lt.s32.totalorder %s835_s16, %s835_s16 }
  0x1d   :  { %p842_p0 = por %p841_p13, %p840_p12 }
  0x1f   :  { %p843_p1 = pnand %p842_p0, %p836_p11 }
  0x21   :  { %846 = shalt.err (!%p843_p1)
}
  0x22   :  { %42 = dma.hbm_to_vmem [thread:$0]  %s1115_s4, 2048, %s37_s8, [#allocation6], %s876_s28, %s876_s28, %s877_s29  }
  0x23   :  { %869 = dma.done.wait [#allocation3], 2048  }
  0x24   :  { %870 = vsyncadd [#allocation3], 4294965248 }
  0x25   :  { %871 = dma.done.wait [#allocation6], 2048  }
  0x26   :  { %872 = vsyncadd [#allocation6], 4294965248  ;;  %v879_v0 = vmov 0.0|0.0   ;;  %vm880_vm0 = vmmov 0   ;;  %v881_v1 = vmov 0.0   ;;  %vm66_vm1 = vcmask 261120  }
  0x27   :  { %691 = vmatprep.subr.bf16.mxu0 %v879_v0  ;;  %583 = vmatprep.mubr.msk.f32.mxu0 %vm880_vm0, %v881_v1  ;;  %v50_v2 = vld [vmem:[%s1112_s1] sm:$0xff]  ;;  %v51_v3 = vld [vmem:[%s1112_s1 + $0x8] sm:$0xff]  ;;  %vm951_vm2 = vmpackc.low %vm66_vm1, %vm66_vm1 }
  0x28   :  { %723 = vmatprep.subr.bf16.mxu1 %v879_v0  ;;  %618 = vmatprep.mubr.msk.f32.mxu1 %vm880_vm0, %v881_v1  ;;  %v692_v5 = vpack.c.bf16 %v51_v3, %v50_v2  ;;  %v52_v6 = vld [vmem:[%s1112_s1 + $0x10] sm:$0xff]  ;;  %v53_v7 = vld [vmem:[%s1112_s1 + $0x18] sm:$0xff]  ;;  %v188_v8 = vld [vmem:[%s1113_s2] sm:$0xff] }
  0x29   :  { %v189_v9 = vld [vmem:[%s1113_s2 + $0x8] sm:$0xff]  ;;  %v696_v10 = vpack.c.bf16 %v53_v7, %v52_v6  ;;  %v190_v12 = vld [vmem:[%s1113_s2 + $0x10] sm:$0xff]  ;;  %v191_v13 = vld [vmem:[%s1113_s2 + $0x18] sm:$0xff] }
  0x2a   :  { %694 = vmatpush3.bf16.xpose.msk.msra.mxu0 %vm951_vm2, %v692_v5  ;;  %v724_v11 = vpack.c.bf16 %v189_v9, %v188_v8  ;;  %v54_v14 = vld [vmem:[%s1112_s1 + $0x20] sm:$0xff]  ;;  %v55_v15 = vld [vmem:[%s1112_s1 + $0x28] sm:$0xff]  ;;  %v727_v16 = vpack.c.bf16 %v191_v13, %v190_v12  ;;  %v56_v20 = vld [vmem:[%s1112_s1 + $0x30] sm:$0xff] }
  0x2b   :  { %695 = vmatprep.subr.bf16.mxu0 %v879_v0  ;;  %v700_v17 = vpack.c.bf16 %v55_v15, %v54_v14  ;;  %v192_v18 = vld [vmem:[%s1113_s2 + $0x20] sm:$0xff]  ;;  %v193_v19 = vld [vmem:[%s1113_s2 + $0x28] sm:$0xff]  ;;  %v57_v21 = vld [vmem:[%s1112_s1 + $0x38] sm:$0xff] }
  0x2c   :  { %725 = vmatpush3.bf16.xpose.msra.mxu1 %v724_v11  ;;  %v730_v22 = vpack.c.bf16 %v193_v19, %v192_v18  ;;  %v704_v23 = vpack.c.bf16 %v57_v21, %v56_v20  ;;  %v194_v24 = vld [vmem:[%s1113_s2 + $0x30] sm:$0xff]  ;;  %v195_v25 = vld [vmem:[%s1113_s2 + $0x38] sm:$0xff]  ;;  %v58_v26 = vld [vmem:[%s1112_s1 + $0x40] sm:$0xff] }
  0x2d   :  { %726 = vmatprep.subr.bf16.mxu1 %v879_v0  ;;  %v59_v27 = vld [vmem:[%s1112_s1 + $0x48] sm:$0xff]  ;;  %v733_v28 = vpack.c.bf16 %v195_v25, %v194_v24  ;;  %v196_v30 = vld [vmem:[%s1113_s2 + $0x40] sm:$0xff]  ;;  %v60_v32 = vld [vmem:[%s1112_s1 + $0x50] sm:$0xff] }
  0x2e   :  { %v708_v29 = vpack.c.bf16 %v59_v27, %v58_v26  ;;  %v197_v31 = vld [vmem:[%s1113_s2 + $0x48] sm:$0xff]  ;;  %v61_v33 = vld [vmem:[%s1112_s1 + $0x58] sm:$0xff]  ;;  %v198_v36 = vld [vmem:[%s1113_s2 + $0x50] sm:$0xff] }
  0x2f   :  { %v736_v34 = vpack.c.bf16 %v197_v31, %v196_v30  ;;  %v712_v35 = vpack.c.bf16 %v61_v33, %v60_v32  ;;  %v199_v37 = vld [vmem:[%s1113_s2 + $0x58] sm:$0xff]  ;;  %v62_v38 = vld [vmem:[%s1112_s1 + $0x60] sm:$0xff]  ;;  %v63_v39 = vld [vmem:[%s1112_s1 + $0x68] sm:$0xff] }
  0x30   :  { %v739_v40 = vpack.c.bf16 %v199_v37, %v198_v36  ;;  %v716_v41 = vpack.c.bf16 %v63_v39, %v62_v38  ;;  %v200_v42 = vld [vmem:[%s1113_s2 + $0x60] sm:$0xff]  ;;  %v201_v43 = vld [vmem:[%s1113_s2 + $0x68] sm:$0xff]  ;;  %v64_v44 = vld [vmem:[%s1112_s1 + $0x70] sm:$0xff] }
  0x31   :  { %v65_v45 = vld [vmem:[%s1112_s1 + $0x78] sm:$0xff]  ;;  %v742_v46 = vpack.c.bf16 %v201_v43, %v200_v42  ;;  %v202_v48 = vld [vmem:[%s1113_s2 + $0x70] sm:$0xff]  ;;  %v49_v51 = vld [vmem:[%s1111_s0] sm:$0xff]  ;;  %s882_s0 = smov [#allocation7]  }
  0x32   :  { %698 = vmatpush3.bf16.xpose.msk.msra.mxu0 %vm951_vm2, %v696_v10  ;;  %v720_v47 = vpack.c.bf16 %v65_v45, %v64_v44  ;;  %v203_v49 = vld [vmem:[%s1113_s2 + $0x78] sm:$0xff]  ;;  %v275_v52 = vld [vmem:[#allocation2] sm:$0xff]  ;;  %v276_v53 = vld [vmem:[#allocation2 + $0x8] sm:$0xff]  ;;  %s456_s2 = sshll.u32 %s882_s0, 4  ;;  %s457_s2 = int_to_ptr.vmem [resolvable:$true] %s456_s2 }
  0x33   :  { %699 = vmatprep.subr.bf16.mxu0 %v879_v0  ;;  %v745_v50 = vpack.c.bf16 %v203_v49, %v202_v48  ;;  %v748_v54 = vpack.c.bf16 %v276_v53, %v275_v52  ;;  %v277_v55 = vld [vmem:[#allocation2 + $0x10] sm:$0xff]  ;;  %v278_v56 = vld [vmem:[#allocation2 + $0x18] sm:$0xff]  ;;  %v279_v58 = vld [vmem:[#allocation2 + $0x20] sm:$0xff]  ;;  %s847_s28 = scalar_lea.vmem %s457_s2, 128  ;;  %p852_p3 = scmp.lt.s32.totalorder %s457_s2, %s457_s2 }
  0x34   :  { %728 = vmatpush3.bf16.xpose.msra.mxu1 %v727_v16  ;;  %v751_v57 = vpack.c.bf16 %v278_v56, %v277_v55  ;;  %v280_v59 = vld [vmem:[#allocation2 + $0x28] sm:$0xff]  ;;  %v281_v61 = vld [vmem:[#allocation2 + $0x30] sm:$0xff]  ;;  %v282_v62 = vld [vmem:[#allocation2 + $0x38] sm:$0xff]  ;;  %p848_p2 = scmp.ne.s32.totalorder %s457_s2, %s847_s28  ;;  %p853_p4 = scmp.lt.s32.totalorder %s847_s28, %s847_s28 }
  0x35   :  { %729 = vmatprep.subr.bf16.mxu1 %v879_v0  ;;  %v754_v60 = vpack.c.bf16 %v280_v59, %v279_v58  ;;  %v757_v63 = vpack.c.bf16 %v282_v62, %v281_v61  ;;  %v283_v2 = vld [vmem:[#allocation2 + $0x40] sm:$0xff]  ;;  %v284_v3 = vld [vmem:[#allocation2 + $0x48] sm:$0xff]  ;;  %v285_v5 = vld [vmem:[#allocation2 + $0x50] sm:$0xff] }
  0x36   :  { %v760_v4 = vpack.c.bf16 %v284_v3, %v283_v2  ;;  %v286_v6 = vld [vmem:[#allocation2 + $0x58] sm:$0xff]  ;;  %v287_v8 = vld [vmem:[#allocation2 + $0x60] sm:$0xff]  ;;  %v288_v9 = vld [vmem:[#allocation2 + $0x68] sm:$0xff]  ;;  %p854_p5 = por %p853_p4, %p852_p3 }
  0x37   :  { %v763_v7 = vpack.c.bf16 %v286_v6, %v285_v5  ;;  %v766_v10 = vpack.c.bf16 %v288_v9, %v287_v8  ;;  %v289_v11 = vld [vmem:[#allocation2 + $0x70] sm:$0xff]  ;;  %v290_v12 = vld [vmem:[#allocation2 + $0x78] sm:$0xff]  ;;  %v362_v16 = vld [vmem:[#allocation5] sm:$0xff] }
  0x38   :  { %v769_v13 = vpack.c.bf16 %v290_v12, %v289_v11  ;;  %v364_v19 = vld [vmem:[#allocation5 + $0x10] sm:$0xff]  ;;  %v365_v20 = vld [vmem:[#allocation5 + $0x18] sm:$0xff]  ;;  %v370_v27 = vld [vmem:[#allocation5 + $0x40] sm:$0xff]  ;;  %p855_p6 = pnand %p854_p5, %p848_p2 }
  0x39   :  { %v775_v21 = vpack.c.bf16 %v365_v20, %v364_v19  ;;  %v368_v25 = vld [vmem:[#allocation5 + $0x30] sm:$0xff]  ;;  %v373_v31 = vld [vmem:[#allocation5 + $0x58] sm:$0xff]  ;;  %v374_v33 = vld [vmem:[#allocation5 + $0x60] sm:$0xff] }
  0x3a   :  { %702 = vmatpush3.bf16.xpose.msk.msra.mxu0 %vm951_vm2, %v700_v17  ;;  %v363_v17 = vld [vmem:[#allocation5 + $0x8] sm:$0xff]  ;;  %v372_v30 = vld [vmem:[#allocation5 + $0x50] sm:$0xff]  ;;  %v377_v37 = vld [vmem:[#allocation5 + $0x78] sm:$0xff] }
  0x3b   :  { %703 = vmatprep.subr.bf16.mxu0 %v879_v0  ;;  %v772_v18 = vpack.c.bf16 %v363_v17, %v362_v16  ;;  %v787_v32 = vpack.c.bf16 %v373_v31, %v372_v30  ;;  %v376_v36 = vld [vmem:[#allocation5 + $0x70] sm:$0xff] }
  0x3c   :  { %731 = vmatpush3.bf16.xpose.msra.mxu1 %v730_v22  ;;  %v366_v22 = vld [vmem:[#allocation5 + $0x20] sm:$0xff]  ;;  %v793_v38 = vpack.c.bf16 %v377_v37, %v376_v36 }
  0x3d   :  { %732 = vmatprep.subr.bf16.mxu1 %v879_v0 }
  0x42   :  { %706 = vmatpush3.bf16.xpose.msk.msra.mxu0 %vm951_vm2, %v704_v23  ;;  %v367_v23 = vld [vmem:[#allocation5 + $0x28] sm:$0xff] }
  0x43   :  { %707 = vmatprep.subr.bf16.mxu0 %v879_v0  ;;  %v778_v24 = vpack.c.bf16 %v367_v23, %v366_v22 }
  0x44   :  { %734 = vmatpush3.bf16.xpose.msra.mxu1 %v733_v28  ;;  %v371_v28 = vld [vmem:[#allocation5 + $0x48] sm:$0xff] }
  0x45   :  { %735 = vmatprep.subr.bf16.mxu1 %v879_v0 }
  0x4a   :  { %710 = vmatpush3.bf16.xpose.msk.msra.mxu0 %vm951_vm2, %v708_v29  ;;  %v784_v29 = vpack.c.bf16 %v371_v28, %v370_v27 }
  0x4b   :  { %711 = vmatprep.subr.bf16.mxu0 %v879_v0 }
  0x4c   :  { %737 = vmatpush3.bf16.xpose.msra.mxu1 %v736_v34  ;;  %v375_v34 = vld [vmem:[#allocation5 + $0x68] sm:$0xff] }
  0x4d   :  { %738 = vmatprep.subr.bf16.mxu1 %v879_v0 }
  0x52   :  { %714 = vmatpush3.bf16.xpose.msk.msra.mxu0 %vm951_vm2, %v712_v35  ;;  %v790_v35 = vpack.c.bf16 %v375_v34, %v374_v33 }
  0x53   :  { %715 = vmatprep.subr.bf16.mxu0 %v879_v0 }
  0x54   :  { %740 = vmatpush3.bf16.xpose.msra.mxu1 %v739_v40 }
  0x55   :  { %741 = vmatprep.subr.bf16.mxu1 %v879_v0 }
  0x5a   :  { %718 = vmatpush3.bf16.xpose.msk.msra.mxu0 %vm951_vm2, %v716_v41 }
  0x5b   :  { %719 = vmatprep.subr.bf16.mxu0 %v879_v0 }
  0x5c   :  { %743 = vmatpush3.bf16.xpose.msra.mxu1 %v742_v46 }
  0x5d   :  { %744 = vmatprep.subr.bf16.mxu1 %v879_v0 }
  0x62   :  { %722 = vmatpush3.bf16.xpose.msk.msra.mxu0 %vm951_vm2, %v720_v47 }
  0x63   :  { %747 = vmatprep.subr.bf16.mxu0 %v879_v0 }
  0x64   :  { %746 = vmatpush3.bf16.xpose.msra.mxu1 %v745_v50 }
  0x65   :  { %771 = vmatprep.subr.bf16.mxu1 %v879_v0 }
  0x69   :  { %584 = vmatmul.mubr.msk.f32.vlgmr.msra.gmra.mrb[0].mxu0 %vm66_vm1, %v49_v51 }
  0x6a   :  { %653 = vmatprep.mubr.msk.f32.mxu0 %vm880_vm0, %v881_v1  ;;  %749 = vmatpush3.bf16.xpose.msra.mxu0 %v748_v54 }
  0x6b   :  { %750 = vmatprep.subr.bf16.mxu0 %v879_v0 }
  0x72   :  { %752 = vmatpush3.bf16.xpose.msra.mxu0 %v751_v57 }
  0x73   :  { %753 = vmatprep.subr.bf16.mxu0 %v879_v0 }
  0x7a   :  { %755 = vmatpush3.bf16.xpose.msra.mxu0 %v754_v60 }
  0x7b   :  { %756 = vmatprep.subr.bf16.mxu0 %v879_v0 }
  0x82   :  { %758 = vmatpush3.bf16.xpose.msra.mxu0 %v757_v63 }
  0x83   :  { %759 = vmatprep.subr.bf16.mxu0 %v879_v0 }
  0x8a   :  { %761 = vmatpush3.bf16.xpose.msra.mxu0 %v760_v4 }
  0x8b   :  { %762 = vmatprep.subr.bf16.mxu0 %v879_v0 }
  0x92   :  { %764 = vmatpush3.bf16.xpose.msra.mxu0 %v763_v7 }
  0x93   :  { %765 = vmatprep.subr.bf16.mxu0 %v879_v0 }
  0x9a   :  { %767 = vmatpush3.bf16.xpose.msra.mxu0 %v766_v10 }
  0x9b   :  { %768 = vmatprep.subr.bf16.mxu0 %v879_v0 }
  0xa2   :  { %770 = vmatpush3.bf16.xpose.msra.mxu0 %v769_v13 }
 0x13c   :  { %v184_v14 = vpop.f32.mrb[0].mxu0 }
 0x13d   :  { %v585_v15 = vpop.f32.mrb[1].mxu0  ;;  %619 = vmatmul.mubr.f32.vlgmr.msra.gmra.mrb[0].mxu1 %v184_v14 }
 0x13e   :  { %688 = vmatprep.mubr.msk.f32.mxu1 %vm880_vm0, %v881_v1  ;;  %773 = vmatpush3.bf16.xpose.msra.mxu1 %v772_v18  ;;  %v369_v1 = vld [vmem:[#allocation5 + $0x38] sm:$0xff] }
 0x13f   :  { %774 = vmatprep.subr.bf16.mxu1 %v879_v0  ;;  %v781_v26 = vpack.c.bf16 %v369_v1, %v368_v25 }
 0x146   :  { %776 = vmatpush3.bf16.xpose.msra.mxu1 %v775_v21 }
 0x147   :  { %777 = vmatprep.subr.bf16.mxu1 %v879_v0 }
 0x14e   :  { %779 = vmatpush3.bf16.xpose.msra.mxu1 %v778_v24 }
 0x14f   :  { %780 = vmatprep.subr.bf16.mxu1 %v879_v0 }
 0x156   :  { %782 = vmatpush3.bf16.xpose.msra.mxu1 %v781_v26 }
 0x157   :  { %783 = vmatprep.subr.bf16.mxu1 %v879_v0 }
 0x15e   :  { %785 = vmatpush3.bf16.xpose.msra.mxu1 %v784_v29 }
 0x15f   :  { %786 = vmatprep.subr.bf16.mxu1 %v879_v0 }
 0x166   :  { %788 = vmatpush3.bf16.xpose.msra.mxu1 %v787_v32 }
 0x167   :  { %789 = vmatprep.subr.bf16.mxu1 %v879_v0 }
 0x16e   :  { %791 = vmatpush3.bf16.xpose.msra.mxu1 %v790_v35 }
 0x16f   :  { %792 = vmatprep.subr.bf16.mxu1 %v879_v0 }
 0x176   :  { %794 = vmatpush3.bf16.xpose.msra.mxu1 %v793_v38 }
 0x210   :  { %v270_v39 = vpop.f32.mrb[0].mxu1 }
 0x211   :  { %v274_v40 = vmax.f32 %v270_v39, 0.0  ;;  %v620_v41 = vpop.f32.mrb[1].mxu1 }
 0x213   :  { %654 = vmatmul.mubr.f32.vlgmr.msra.gmra.mrb[2].mxu0 %v274_v40 }
 0x2e6   :  { %v357_v42 = vpop.f32.mrb[2].mxu0 }
 0x2e7   :  { %v361_v43 = vmax.f32 %v357_v42, 0.0  ;;  %v655_v44 = vpop.f32.mrb[3].mxu0 }
 0x2e9   :  { %689 = vmatmul.mubr.f32.vlgmr.msra.gmra.mrb[2].mxu1 %v361_v43 }
 0x3bc   :  { %v444_v45 = vpop.f32.mrb[2].mxu1 }
 0x3bd   :  { %v448_v46 = vmax.f32 %v444_v45, 0.0  ;;  %v690_v47 = vpop.f32.mrb[3].mxu1 }
 0x3bf   :  { %449 = vst [vmem:[#allocation7] sm:$0xff] %v448_v46 }
 0x3c0   :  { %858 = shalt.err (!%p855_p6)
}
 0x3c1   :  { %s859_s6 = scalar_lea.hbm %s1116_s5, 128 }
 0x3c2   :  { %p860_p7 = scmp.ne.s32.totalorder %s1116_s5, %s859_s6  ;;  %p863_p8 = scmp.lt.u32.totalorder %s859_s6, %s1116_s5 }
 0x3c4   :  { %p865_p9 = pnand %p863_p8, %p860_p7 }
 0x3c6   :  { %868 = shalt.err (!%p865_p9)
}
 0x3c7   :  { %459 = dma.vmem_to_hbm [thread:$0]  %s457_s2, 128, %s1116_s5, [#allocation4]  }
 0x3c8   :  { %873 = dma.done.wait [#allocation4], 128  }
 0x3c9   :  { %874 = vsyncadd [#allocation4], 4294967168 }
 0x3ca   :  { %463 = vsyncpa [#allocation3], 1 }
 0x3cb   :  { %464 = vsyncpa [#allocation6], 1 }
 0x3cc   :  { %465 = vsyncpa [#allocation4], 1 }

</bundles_post_ra>
